<compile_context>
chip_gen: v7x
topology: tpu7x:2x2x1
jax: 0.10.0
libtpu: 0.0.40
codegen_flags: <defaults>
</compile_context>

<pallas_src>
import functools

import jax
import jax.numpy as jnp
from jax import lax
from jax.experimental import pallas as pl
from jax.experimental.pallas import tpu as pltpu

NEG_SLOPE = 0.01   # PyTorch nn.LeakyReLU() default
BN_EPS = 1e-5      # PyTorch nn.BatchNorm2d default eps


def _resblock_kernel(x_ref, m1_ref, s1_ref, b1_ref, m2_ref, s2_ref, b2_ref,
                     o_ref, *, H, WC):
    """One grid step == one image of the batch.

    x_ref  : (1, H, W*C)    lane-dense activation slab (channels-last)
    m*_ref : (3, W*C, W*C)  per-dy block-banded conv weight matrices
    s*/b*  : (1, W*C)       folded BatchNorm scale / bias, tiled over W
    o_ref  : (1, H, W*C)    output slab
    """
    x = x_ref[0]                                          # (H, W*C) f32

    def conv_bn_act(lhs, m_ref, s_row, b_row):
        # dx taps + channel contraction + width zero-padding all live inside
        # the band matrices, so the three matmuls share the same unshifted LHS
        # and the tap accumulation happens on the MXU.
        r0 = jnp.dot(lhs, m_ref[0], preferred_element_type=jnp.float32)
        r1 = jnp.dot(lhs, m_ref[1], preferred_element_type=jnp.float32)
        r2 = jnp.dot(lhs, m_ref[2], preferred_element_type=jnp.float32)
        zrow = jnp.zeros((1, WC), jnp.float32)
        acc = (r1
               + jnp.concatenate([zrow, r0[:H - 1]], axis=0)   # out[y] += r0[y-1]
               + jnp.concatenate([r2[1:], zrow], axis=0))      # out[y] += r2[y+1]
        y = acc * s_row + b_row                                 # folded BN (eval)
        return jnp.where(y > 0, y, NEG_SLOPE * y)               # LeakyReLU

    y1 = conv_bn_act(x, m1_ref, s1_ref[...], b1_ref[...])
    y2 = conv_bn_act(y1, m2_ref, s2_ref[...], b2_ref[...])
    o_ref[0] = (x + y2).astype(o_ref.dtype)                     # residual add


def _band_matrices(w, W, C):
    """w: (3, 3, C, C) HWIO conv weights -> (3, W*C, W*C) band matrices.

    m[dy, i*C + ci, j*C + co] = w[dy, i - j + 1, ci, co] if |i - j| <= 1 else 0.
    Right-multiplying an (H, W*C) activation row-slab by m[dy] performs the dx
    taps, the input-channel contraction and the width zero-padding of a
    stride-1 / pad-1 3x3 conv in one dense matmul.
    """
    i = jnp.arange(W)[:, None]
    j = jnp.arange(W)[None, :]
    dx = i - j + 1                                            # (W, W)
    mask = ((dx >= 0) & (dx <= 2)).astype(w.dtype)            # 3-wide band
    blocks = w[:, jnp.clip(dx, 0, 2)]                         # (3, W, W, C, C)
    blocks = blocks * mask[None, :, :, None, None]
    return blocks.transpose(0, 1, 3, 2, 4).reshape(3, W * C, W * C)


def resblock_pallas(x_nchw, w1, s1, b1, w2, s2, b2):
    """x_nchw: (N, C, H, W) f32; w*: (3,3,C,C) HWIO; s*/b*: (C,) folded BN."""
    N, C, H, W = x_nchw.shape
    WC = W * C

    # NCHW -> lane-dense (N, H, W*C) slab.  No jnp.pad: the spatial padding is
    # folded into the band matrices (width) and the in-kernel row shifts (height).
    x_slab = jnp.transpose(x_nchw, (0, 2, 3, 1)).reshape(N, H, WC)

    m1 = _band_matrices(w1.astype(jnp.float32), W, C)
    m2 = _band_matrices(w2.astype(jnp.float32), W, C)

    # Per-channel folded BN scale/bias tiled across the W*C lane axis.
    s1r = jnp.tile(s1.astype(jnp.float32), W).reshape(1, WC)
    b1r = jnp.tile(b1.astype(jnp.float32), W).reshape(1, WC)
    s2r = jnp.tile(s2.astype(jnp.float32), W).reshape(1, WC)
    b2r = jnp.tile(b2.astype(jnp.float32), W).reshape(1, WC)

    kernel = functools.partial(_resblock_kernel, H=H, WC=WC)

    out_slab = pl.pallas_call(
        kernel,
        out_shape=jax.ShapeDtypeStruct((N, H, WC), jnp.float32),
        grid_spec=pltpu.PrefetchScalarGridSpec(
            num_scalar_prefetch=0,
            grid=(N,),
            in_specs=[
                pl.BlockSpec((1, H, WC), lambda n: (n, 0, 0)),
                pl.BlockSpec((3, WC, WC), lambda n: (0, 0, 0)),
                pl.BlockSpec((1, WC), lambda n: (0, 0)),
                pl.BlockSpec((1, WC), lambda n: (0, 0)),
                pl.BlockSpec((3, WC, WC), lambda n: (0, 0, 0)),
                pl.BlockSpec((1, WC), lambda n: (0, 0)),
                pl.BlockSpec((1, WC), lambda n: (0, 0)),
            ],
            out_specs=pl.BlockSpec((1, H, WC), lambda n: (n, 0, 0)),
        ),
        compiler_params=pltpu.CompilerParams(
            dimension_semantics=("parallel",)),
    )(x_slab, m1, s1r, b1r, m2, s2r, b2r)

    # Lane-dense slab back to NCHW for the PyTorch-facing interface.
    return jnp.transpose(out_slab.reshape(N, H, W, C), (0, 3, 1, 2))


def _fold_bn(gamma, beta, mean, var):
    scale = gamma / jnp.sqrt(var + BN_EPS)
    bias = beta - mean * scale
    return scale, bias


def _reference(x_nchw, w1, s1, b1, w2, s2, b2):
    """Pure-JAX reference (lax.conv) for the correctness check."""
    x = jnp.transpose(x_nchw, (0, 2, 3, 1))  # NHWC
    dn = ("NHWC", "HWIO", "NHWC")

    def conv_block(h, w, s, b):
        y = lax.conv_general_dilated(h, w, (1, 1), ((1, 1), (1, 1)),
                                     dimension_numbers=dn)
        y = y * s.reshape(1, 1, 1, -1) + b.reshape(1, 1, 1, -1)
        return jnp.where(y > 0, y, NEG_SLOPE * y)

    y = conv_block(x, w1, s1, b1)
    y = conv_block(y, w2, s2, b2)
    return jnp.transpose(x + y, (0, 3, 1, 2))


if __name__ == "__main__":
    # ResBlock(n=4), input (batch=2, channels=4, H=W=16)
    N, C, H, W = 2, 4, 16, 16
    key = jax.random.PRNGKey(0)
    kx, kw1, kw2, kg1, kb1, km1, kv1, kg2, kb2, km2, kv2 = jax.random.split(key, 11)

    x = jax.random.normal(kx, (N, C, H, W), jnp.float32)

    # Conv weights in HWIO layout (3, 3, in_c, out_c), no bias.
    w1 = 0.1 * jax.random.normal(kw1, (3, 3, C, C), jnp.float32)
    w2 = 0.1 * jax.random.normal(kw2, (3, 3, C, C), jnp.float32)

    # Deterministic BatchNorm parameters / running stats (eval mode).
    g1 = 1.0 + 0.1 * jax.random.normal(kg1, (C,), jnp.float32)
    be1 = 0.1 * jax.random.normal(kb1, (C,), jnp.float32)
    rm1 = 0.1 * jax.random.normal(km1, (C,), jnp.float32)
    rv1 = 1.0 + 0.1 * jax.random.uniform(kv1, (C,), jnp.float32)
    g2 = 1.0 + 0.1 * jax.random.normal(kg2, (C,), jnp.float32)
    be2 = 0.1 * jax.random.normal(kb2, (C,), jnp.float32)
    rm2 = 0.1 * jax.random.normal(km2, (C,), jnp.float32)
    rv2 = 1.0 + 0.1 * jax.random.uniform(kv2, (C,), jnp.float32)

    s1, b1 = _fold_bn(g1, be1, rm1, rv1)
    s2, b2 = _fold_bn(g2, be2, rm2, rv2)

    run = jax.jit(resblock_pallas)
    out = jax.block_until_ready(run(x, w1, s1, b1, w2, s2, b2))
    ref = jax.block_until_ready(_reference(x, w1, s1, b1, w2, s2, b2))

    assert out.shape == (N, C, H, W)
    assert jnp.max(jnp.abs(out - ref)) < 1e-4

    print("KERNEL_OK")
</pallas_src>

<mosaic_0001>
module attributes {stable_mosaic.version = 11 : i64} {
  func.func @_resblock_kernel(%arg0: i32, %arg1: memref<1x16x64xf32, #tpu.memory_space<vmem>>, %arg2: memref<3x64x64xf32, #tpu.memory_space<vmem>>, %arg3: memref<1x64xf32, #tpu.memory_space<vmem>>, %arg4: memref<1x64xf32, #tpu.memory_space<vmem>>, %arg5: memref<3x64x64xf32, #tpu.memory_space<vmem>>, %arg6: memref<1x64xf32, #tpu.memory_space<vmem>>, %arg7: memref<1x64xf32, #tpu.memory_space<vmem>>, %arg8: memref<1x16x64xf32, #tpu.memory_space<vmem>>) attributes {dimension_semantics = [#tpu.dimension_semantics<parallel>], iteration_bounds = array<i64: 2>, scalar_prefetch = 0 : i64, scratch_operands = 0 : i64, tpu.core_type = #tpu.core_type<tc>, window_params = [{transform_indices = @transform_0, window_bounds = array<i64: 1, 16, 64>}, {pipeline_mode = #tpu.pipeline_mode<synchronous>, transform_indices = @transform_1, window_bounds = array<i64: 3, 64, 64>}, {pipeline_mode = #tpu.pipeline_mode<synchronous>, transform_indices = @transform_2, window_bounds = array<i64: 1, 64>}, {pipeline_mode = #tpu.pipeline_mode<synchronous>, transform_indices = @transform_3, window_bounds = array<i64: 1, 64>}, {pipeline_mode = #tpu.pipeline_mode<synchronous>, transform_indices = @transform_4, window_bounds = array<i64: 3, 64, 64>}, {pipeline_mode = #tpu.pipeline_mode<synchronous>, transform_indices = @transform_5, window_bounds = array<i64: 1, 64>}, {pipeline_mode = #tpu.pipeline_mode<synchronous>, transform_indices = @transform_6, window_bounds = array<i64: 1, 64>}, {transform_indices = @transform_7, window_bounds = array<i64: 1, 16, 64>}]} {
    %c0 = arith.constant 0 : index
    %c0_0 = arith.constant 0 : index
    %c0_1 = arith.constant 0 : index
    %0 = vector.load %arg1[%c0, %c0_0, %c0_1] : memref<1x16x64xf32, #tpu.memory_space<vmem>>, vector<1x16x64xf32>
    %1 = vector.shape_cast %0 : vector<1x16x64xf32> to vector<16x64xf32>
    %c0_2 = arith.constant 0 : index
    %c0_3 = arith.constant 0 : index
    %2 = vector.load %arg3[%c0_2, %c0_3] : memref<1x64xf32, #tpu.memory_space<vmem>>, vector<1x64xf32>
    %c0_4 = arith.constant 0 : index
    %c0_5 = arith.constant 0 : index
    %3 = vector.load %arg4[%c0_4, %c0_5] : memref<1x64xf32, #tpu.memory_space<vmem>>, vector<1x64xf32>
    %c0_6 = arith.constant 0 : index
    %c0_7 = arith.constant 0 : index
    %c0_8 = arith.constant 0 : index
    %4 = vector.load %arg2[%c0_6, %c0_7, %c0_8] : memref<3x64x64xf32, #tpu.memory_space<vmem>>, vector<1x64x64xf32>
    %5 = vector.shape_cast %4 : vector<1x64x64xf32> to vector<64x64xf32>
    %cst = arith.constant dense<0.000000e+00> : vector<16x64xf32>
    %6 = tpu.matmul %1, %5, %cst {dimension_numbers = #tpu.dot_dimension_numbers<[1], [0], [0], [1], [0, 0, 1, 1], [], []>} : vector<16x64xf32>, vector<64x64xf32>, vector<16x64xf32> -> vector<16x64xf32>
    %c1 = arith.constant 1 : index
    %c0_9 = arith.constant 0 : index
    %c0_10 = arith.constant 0 : index
    %7 = vector.load %arg2[%c1, %c0_9, %c0_10] : memref<3x64x64xf32, #tpu.memory_space<vmem>>, vector<1x64x64xf32>
    %8 = vector.shape_cast %7 : vector<1x64x64xf32> to vector<64x64xf32>
    %cst_11 = arith.constant dense<0.000000e+00> : vector<16x64xf32>
    %9 = tpu.matmul %1, %8, %cst_11 {dimension_numbers = #tpu.dot_dimension_numbers<[1], [0], [0], [1], [0, 0, 1, 1], [], []>} : vector<16x64xf32>, vector<64x64xf32>, vector<16x64xf32> -> vector<16x64xf32>
    %c2 = arith.constant 2 : index
    %c0_12 = arith.constant 0 : index
    %c0_13 = arith.constant 0 : index
    %10 = vector.load %arg2[%c2, %c0_12, %c0_13] : memref<3x64x64xf32, #tpu.memory_space<vmem>>, vector<1x64x64xf32>
    %11 = vector.shape_cast %10 : vector<1x64x64xf32> to vector<64x64xf32>
    %cst_14 = arith.constant dense<0.000000e+00> : vector<16x64xf32>
    %12 = tpu.matmul %1, %11, %cst_14 {dimension_numbers = #tpu.dot_dimension_numbers<[1], [0], [0], [1], [0, 0, 1, 1], [], []>} : vector<16x64xf32>, vector<64x64xf32>, vector<16x64xf32> -> vector<16x64xf32>
    %cst_15 = arith.constant 0.000000e+00 : f32
    %13 = vector.broadcast %cst_15 : f32 to vector<1x64xf32>
    %14 = vector.extract_strided_slice %6 {offsets = [0, 0], sizes = [15, 64], strides = [1, 1]} : vector<16x64xf32> to vector<15x64xf32>
    %15 = tpu.concatenate %13, %14 in 0 : vector<1x64xf32>, vector<15x64xf32> -> vector<16x64xf32>
    %16 = arith.addf %9, %15 : vector<16x64xf32>
    %17 = vector.extract_strided_slice %12 {offsets = [1, 0], sizes = [15, 64], strides = [1, 1]} : vector<16x64xf32> to vector<15x64xf32>
    %18 = tpu.concatenate %17, %13 in 0 : vector<15x64xf32>, vector<1x64xf32> -> vector<16x64xf32>
    %19 = arith.addf %16, %18 : vector<16x64xf32>
    %20 = vector.broadcast %2 : vector<1x64xf32> to vector<16x64xf32>
    %21 = arith.mulf %19, %20 : vector<16x64xf32>
    %22 = vector.broadcast %3 : vector<1x64xf32> to vector<16x64xf32>
    %23 = arith.addf %21, %22 : vector<16x64xf32>
    %cst_16 = arith.constant 0.000000e+00 : f32
    %24 = vector.broadcast %cst_16 : f32 to vector<16x64xf32>
    %25 = arith.cmpf ogt, %23, %24 : vector<16x64xf32>
    %cst_17 = arith.constant 0.00999999977 : f32
    %26 = vector.broadcast %cst_17 : f32 to vector<16x64xf32>
    %27 = arith.mulf %26, %23 : vector<16x64xf32>
    %28 = arith.select %25, %23, %27 : vector<16x64xi1>, vector<16x64xf32>
    %c0_18 = arith.constant 0 : index
    %c0_19 = arith.constant 0 : index
    %29 = vector.load %arg6[%c0_18, %c0_19] : memref<1x64xf32, #tpu.memory_space<vmem>>, vector<1x64xf32>
    %c0_20 = arith.constant 0 : index
    %c0_21 = arith.constant 0 : index
    %30 = vector.load %arg7[%c0_20, %c0_21] : memref<1x64xf32, #tpu.memory_space<vmem>>, vector<1x64xf32>
    %c0_22 = arith.constant 0 : index
    %c0_23 = arith.constant 0 : index
    %c0_24 = arith.constant 0 : index
    %31 = vector.load %arg5[%c0_22, %c0_23, %c0_24] : memref<3x64x64xf32, #tpu.memory_space<vmem>>, vector<1x64x64xf32>
    %32 = vector.shape_cast %31 : vector<1x64x64xf32> to vector<64x64xf32>
    %cst_25 = arith.constant dense<0.000000e+00> : vector<16x64xf32>
    %33 = tpu.matmul %28, %32, %cst_25 {dimension_numbers = #tpu.dot_dimension_numbers<[1], [0], [0], [1], [0, 0, 1, 1], [], []>} : vector<16x64xf32>, vector<64x64xf32>, vector<16x64xf32> -> vector<16x64xf32>
    %c1_26 = arith.constant 1 : index
    %c0_27 = arith.constant 0 : index
    %c0_28 = arith.constant 0 : index
    %34 = vector.load %arg5[%c1_26, %c0_27, %c0_28] : memref<3x64x64xf32, #tpu.memory_space<vmem>>, vector<1x64x64xf32>
    %35 = vector.shape_cast %34 : vector<1x64x64xf32> to vector<64x64xf32>
    %cst_29 = arith.constant dense<0.000000e+00> : vector<16x64xf32>
    %36 = tpu.matmul %28, %35, %cst_29 {dimension_numbers = #tpu.dot_dimension_numbers<[1], [0], [0], [1], [0, 0, 1, 1], [], []>} : vector<16x64xf32>, vector<64x64xf32>, vector<16x64xf32> -> vector<16x64xf32>
    %c2_30 = arith.constant 2 : index
    %c0_31 = arith.constant 0 : index
    %c0_32 = arith.constant 0 : index
    %37 = vector.load %arg5[%c2_30, %c0_31, %c0_32] : memref<3x64x64xf32, #tpu.memory_space<vmem>>, vector<1x64x64xf32>
    %38 = vector.shape_cast %37 : vector<1x64x64xf32> to vector<64x64xf32>
    %cst_33 = arith.constant dense<0.000000e+00> : vector<16x64xf32>
    %39 = tpu.matmul %28, %38, %cst_33 {dimension_numbers = #tpu.dot_dimension_numbers<[1], [0], [0], [1], [0, 0, 1, 1], [], []>} : vector<16x64xf32>, vector<64x64xf32>, vector<16x64xf32> -> vector<16x64xf32>
    %cst_34 = arith.constant 0.000000e+00 : f32
    %40 = vector.broadcast %cst_34 : f32 to vector<1x64xf32>
    %41 = vector.extract_strided_slice %33 {offsets = [0, 0], sizes = [15, 64], strides = [1, 1]} : vector<16x64xf32> to vector<15x64xf32>
    %42 = tpu.concatenate %40, %41 in 0 : vector<1x64xf32>, vector<15x64xf32> -> vector<16x64xf32>
    %43 = arith.addf %36, %42 : vector<16x64xf32>
    %44 = vector.extract_strided_slice %39 {offsets = [1, 0], sizes = [15, 64], strides = [1, 1]} : vector<16x64xf32> to vector<15x64xf32>
    %45 = tpu.concatenate %44, %40 in 0 : vector<15x64xf32>, vector<1x64xf32> -> vector<16x64xf32>
    %46 = arith.addf %43, %45 : vector<16x64xf32>
    %47 = vector.broadcast %29 : vector<1x64xf32> to vector<16x64xf32>
    %48 = arith.mulf %46, %47 : vector<16x64xf32>
    %49 = vector.broadcast %30 : vector<1x64xf32> to vector<16x64xf32>
    %50 = arith.addf %48, %49 : vector<16x64xf32>
    %cst_35 = arith.constant 0.000000e+00 : f32
    %51 = vector.broadcast %cst_35 : f32 to vector<16x64xf32>
    %52 = arith.cmpf ogt, %50, %51 : vector<16x64xf32>
    %cst_36 = arith.constant 0.00999999977 : f32
    %53 = vector.broadcast %cst_36 : f32 to vector<16x64xf32>
    %54 = arith.mulf %53, %50 : vector<16x64xf32>
    %55 = arith.select %52, %50, %54 : vector<16x64xi1>, vector<16x64xf32>
    %56 = arith.addf %1, %55 : vector<16x64xf32>
    %c0_37 = arith.constant 0 : index
    %c0_38 = arith.constant 0 : index
    %c0_39 = arith.constant 0 : index
    %57 = vector.load %arg8[%c0_37, %c0_38, %c0_39] : memref<1x16x64xf32, #tpu.memory_space<vmem>>, vector<1x16x64xf32>
    %58 = vector.shape_cast %57 : vector<1x16x64xf32> to vector<16x64xf32>
    %59 = vector.shape_cast %56 : vector<16x64xf32> to vector<1x16x64xf32>
    tpu.vector_store %arg8[%c0_37, %c0_38, %c0_39], %59 {strides = array<i32>} : memref<1x16x64xf32, #tpu.memory_space<vmem>>, vector<1x16x64xf32>,
    return
  }
  func.func @transform_0(%arg0: i32) -> (i32, i32, i32) {
    %c0_i32 = arith.constant 0 : i32
    %c0_i32_0 = arith.constant 0 : i32
    %c0_i32_1 = arith.constant 0 : i32
    return %arg0, %c0_i32, %c0_i32_0 : i32, i32, i32
  }
  func.func @transform_1(%arg0: i32) -> (i32, i32, i32) {
    %c0_i32 = arith.constant 0 : i32
    %c0_i32_0 = arith.constant 0 : i32
    %c0_i32_1 = arith.constant 0 : i32
    %c0_i32_2 = arith.constant 0 : i32
    return %c0_i32, %c0_i32_0, %c0_i32_1 : i32, i32, i32
  }
  func.func @transform_2(%arg0: i32) -> (i32, i32) {
    %c0_i32 = arith.constant 0 : i32
    %c0_i32_0 = arith.constant 0 : i32
    %c0_i32_1 = arith.constant 0 : i32
    return %c0_i32, %c0_i32_0 : i32, i32
  }
  func.func @transform_3(%arg0: i32) -> (i32, i32) {
    %c0_i32 = arith.constant 0 : i32
    %c0_i32_0 = arith.constant 0 : i32
    %c0_i32_1 = arith.constant 0 : i32
    return %c0_i32, %c0_i32_0 : i32, i32
  }
  func.func @transform_4(%arg0: i32) -> (i32, i32, i32) {
    %c0_i32 = arith.constant 0 : i32
    %c0_i32_0 = arith.constant 0 : i32
    %c0_i32_1 = arith.constant 0 : i32
    %c0_i32_2 = arith.constant 0 : i32
    return %c0_i32, %c0_i32_0, %c0_i32_1 : i32, i32, i32
  }
  func.func @transform_5(%arg0: i32) -> (i32, i32) {
    %c0_i32 = arith.constant 0 : i32
    %c0_i32_0 = arith.constant 0 : i32
    %c0_i32_1 = arith.constant 0 : i32
    return %c0_i32, %c0_i32_0 : i32, i32
  }
  func.func @transform_6(%arg0: i32) -> (i32, i32) {
    %c0_i32 = arith.constant 0 : i32
    %c0_i32_0 = arith.constant 0 : i32
    %c0_i32_1 = arith.constant 0 : i32
    return %c0_i32, %c0_i32_0 : i32, i32
  }
  func.func @transform_7(%arg0: i32) -> (i32, i32, i32) {
    %c0_i32 = arith.constant 0 : i32
    %c0_i32_0 = arith.constant 0 : i32
    %c0_i32_1 = arith.constant 0 : i32
    return %arg0, %c0_i32, %c0_i32_0 : i32, i32, i32
  }
}

</mosaic_0001>

<bundles_post_ra>
// kernel: tile.23
= control target key start
LH: loop header
LB: loop body
LE: loop exit
PB: predicated region body
PF: predicated region fallthrough
CT: control target
= control target key end

     0   :  { %s28_s0 = inlined_call_operand.vmem [shape: f32[4], index: 0, kind: input, shape index: {}]   ;;  %s29_s1 = inlined_call_operand.vmem [shape: f32[16,4], index: 1, kind: output, shape index: {}]  }
   0x1   :  { %v4_v0 = vld [vmem:[%s28_s0] ss:$0 sm:$0xff] }
   0x2   :  { %5 = vst [vmem:[%s29_s1] sm:$0xff] %v4_v0  ;;  %8 = vst [vmem:[%s29_s1 + $0x8] sm:$0xff] %v4_v0 }

// kernel: tile.24
= control target key start
LH: loop header
LB: loop body
LE: loop exit
PB: predicated region body
PF: predicated region fallthrough
CT: control target
= control target key end

     0   :  { %s131_s10 = smov 60   ;;  %s132_s11 = smov 52   ;;  %vm3_vm0 = vcmask 31744   ;;  %vm9_vm1 = vcmask 523744   ;;  %vm15_vm2 = vcmask 490944   ;;  %vm21_vm3 = vcmask 458144   ;;  %s207_s0 = inlined_call_operand.vmem [shape: f32[16,4], index: 0, kind: input, shape index: {}]   ;;  %s208_s1 = inlined_call_operand.vmem [shape: f32[1,64], index: 1, kind: output, shape index: {}]  }
   0x1   :  { %v101_v0 = vld [vmem:[%s207_s0 + $0xf] sm:$0x1]   ;;  %v103_v1 = vld [vmem:[%s207_s0 + $0xd] sm:$0x1]   ;;  %v102_v2 = vld [vmem:[%s207_s0 + $0xe] sm:$0x1]  }
   0x2   :  { %7 = vrot.lane.b32.xlu0 %v101_v0, %s131_s10  ;;  %19 = vrot.lane.b32.xlu1 %v103_v1, %s132_s11  ;;  %v104_v3 = vld [vmem:[%s207_s0 + $0xc] sm:$0x1]   ;;  %s133_s16 = smov 56   ;;  %s134_s17 = smov 48   ;;  %v105_v4 = vld [vmem:[%s207_s0 + $0xb] sm:$0x1]  }
   0x3   :  { %v106_v5 = vld [vmem:[%s207_s0 + $0xa] sm:$0x1]   ;;  %v2_v6 = vld [vmem:[%s207_s0] sm:$0x1]   ;;  %s135_s24 = smov 44   ;;  %s136_s25 = smov 40  }
   0x4   :  { %4 = vst.msk [vmem:[#allocation0] sm:$0x1] %vm3_vm0, %v2_v6   ;;  %v107_v7 = vld [vmem:[%s207_s0 + $0x9] sm:$0x1]   ;;  %v108_v8 = vld [vmem:[%s207_s0 + $0x8] sm:$0x1]  }
   0x5   :  { %s137_s30 = smov 36   ;;  %s138_s2 = smov 32   ;;  %v109_v9 = vld [vmem:[%s207_s0 + $0x7] sm:$0x1]   ;;  %v110_v10 = vld [vmem:[%s207_s0 + $0x6] sm:$0x1]  }
   0x6   :  { %13 = vrot.lane.b32.xlu0 %v102_v2, %s133_s16  ;;  %25 = vrot.lane.b32.xlu1 %v104_v3, %s134_s17  ;;  %s139_s7 = smov 28   ;;  %s140_s8 = smov 24   ;;  %v111_v11 = vld [vmem:[%s207_s0 + $0x5] sm:$0x1]   ;;  %v112_v12 = vld [vmem:[%s207_s0 + $0x4] sm:$0x1]  }
   0x7   :  { %s141_s13 = smov 20   ;;  %s142_s14 = smov 16   ;;  %v113_v13 = vld [vmem:[%s207_s0 + $0x3] sm:$0x1]   ;;  %v114_v14 = vld [vmem:[%s207_s0 + $0x2] sm:$0x1]  }
   0x8   :  { %s143_s19 = smov 12   ;;  %s144_s20 = smov 8   ;;  %v115_v15 = vld [vmem:[%s207_s0 + $0x1] sm:$0x1]   ;;  %vm27_vm4 = vcmask 425344   ;;  %vm33_vm5 = vcmask 392544  }
   0x9   :  { %s145_s0 = smov 4   ;;  %vm39_vm6 = vcmask 359744   ;;  %vm45_vm7 = vcmask 326944   ;;  %vm51_vm8 = vcmask 294144   ;;  %vm57_vm9 = vcmask 261344  }
   0xa   :  { %31 = vrot.lane.b32.xlu0 %v105_v4, %s135_s24  ;;  %37 = vrot.lane.b32.xlu1 %v106_v5, %s136_s25  ;;  %vm63_vm10 = vcmask 228544   ;;  %vm69_vm11 = vcmask 195744   ;;  %vm75_vm12 = vcmask 162944   ;;  %vm81_vm13 = vcmask 130144  }
   0xb   :  { %vm87_vm14 = vcmask 97344   ;;  %vm93_vm15 = vcmask 64544  }
   0xe   :  { %43 = vrot.lane.b32.xlu0 %v107_v7, %s137_s30  ;;  %49 = vrot.lane.b32.xlu1 %v108_v8, %s138_s2 }
  0x12   :  { %55 = vrot.lane.b32.xlu0 %v109_v9, %s139_s7  ;;  %61 = vrot.lane.b32.xlu1 %v110_v10, %s140_s8 }
  0x16   :  { %67 = vrot.lane.b32.xlu0 %v111_v11, %s141_s13  ;;  %73 = vrot.lane.b32.xlu1 %v112_v12, %s142_s14 }
  0x1a   :  { %79 = vrot.lane.b32.xlu0 %v113_v13, %s143_s19  ;;  %85 = vrot.lane.b32.xlu1 %v114_v14, %s144_s20 }
  0x1e   :  { %91 = vrot.lane.b32.xlu0 %v115_v15, %s145_s0 }
  0x74   :  { %v8_v16 = vpop.permute.xlu0 %7   ;;  %v20_v17 = vpop.permute.xlu1 %19  }
  0x75   :  { %10 = vst.msk [vmem:[#allocation0] sm:$0x1] %vm9_vm1, %v8_v16  }
  0x78   :  { %v14_v18 = vpop.permute.xlu0 %13   ;;  %v26_v19 = vpop.permute.xlu1 %25  }
  0x79   :  { %16 = vst.msk [vmem:[#allocation0] sm:$0x1] %vm15_vm2, %v14_v18  }
  0x7a   :  { %22 = vst.msk [vmem:[#allocation0] sm:$0x1] %vm21_vm3, %v20_v17  }
  0x7b   :  { %28 = vst.msk [vmem:[#allocation0] sm:$0x1] %vm27_vm4, %v26_v19  }
  0x7c   :  { %v32_v20 = vpop.permute.xlu0 %31   ;;  %v38_v21 = vpop.permute.xlu1 %37  }
  0x7d   :  { %34 = vst.msk [vmem:[#allocation0] sm:$0x1] %vm33_vm5, %v32_v20  }
  0x7e   :  { %40 = vst.msk [vmem:[#allocation0] sm:$0x1] %vm39_vm6, %v38_v21  }
  0x80   :  { %v44_v22 = vpop.permute.xlu0 %43   ;;  %v50_v23 = vpop.permute.xlu1 %49  }
  0x81   :  { %46 = vst.msk [vmem:[#allocation0] sm:$0x1] %vm45_vm7, %v44_v22  }
  0x82   :  { %52 = vst.msk [vmem:[#allocation0] sm:$0x1] %vm51_vm8, %v50_v23  }
  0x84   :  { %v56_v24 = vpop.permute.xlu0 %55   ;;  %v62_v25 = vpop.permute.xlu1 %61  }
  0x85   :  { %58 = vst.msk [vmem:[#allocation0] sm:$0x1] %vm57_vm9, %v56_v24  }
  0x86   :  { %64 = vst.msk [vmem:[#allocation0] sm:$0x1] %vm63_vm10, %v62_v25  }
  0x88   :  { %v68_v26 = vpop.permute.xlu0 %67   ;;  %v74_v27 = vpop.permute.xlu1 %73  }
  0x89   :  { %70 = vst.msk [vmem:[#allocation0] sm:$0x1] %vm69_vm11, %v68_v26  }
  0x8a   :  { %76 = vst.msk [vmem:[#allocation0] sm:$0x1] %vm75_vm12, %v74_v27  }
  0x8c   :  { %v80_v28 = vpop.permute.xlu0 %79   ;;  %v86_v29 = vpop.permute.xlu1 %85  }
  0x8d   :  { %82 = vst.msk [vmem:[#allocation0] sm:$0x1] %vm81_vm13, %v80_v28  }
  0x8e   :  { %88 = vst.msk [vmem:[#allocation0] sm:$0x1] %vm87_vm14, %v86_v29  }
  0x90   :  { %v92_v30 = vpop.permute.xlu0 %91  }
  0x91   :  { %94 = vst.msk [vmem:[#allocation0] sm:$0x1] %vm93_vm15, %v92_v30  }
  0x98   :  { %v98_v31 = vld [vmem:[#allocation0] sm:$0x1] }
  0x99   :  { %100 = vst [vmem:[%s208_s1] sm:$0x1] %v98_v31 }

// kernel: resblock_pallas.1
= control target key start
LH: loop header
LB: loop body
LE: loop exit
PB: predicated region body
PF: predicated region fallthrough
CT: control target
= control target key end

     0   :  { %s1328_s24 = smov 0   ;;  %s1542_s0 = inlined_call_operand.vmem [shape: f32[2,16,64], index: 0, kind: input, shape index: {}]   ;;  %s1543_s1 = inlined_call_operand.vmem [shape: f32[3,64,64], index: 1, kind: input, shape index: {}]   ;;  %s1544_s2 = inlined_call_operand.vmem [shape: f32[1,64], index: 2, kind: input, shape index: {}]   ;;  %s1545_s3 = inlined_call_operand.vmem [shape: f32[1,64], index: 3, kind: input, shape index: {}]   ;;  %s1546_s4 = inlined_call_operand.vmem [shape: f32[3,64,64], index: 4, kind: input, shape index: {}]   ;;  %s1547_s5 = inlined_call_operand.vmem [shape: f32[1,64], index: 5, kind: input, shape index: {}]   ;;  %s1548_s6 = inlined_call_operand.vmem [shape: f32[1,64], index: 6, kind: input, shape index: {}]   ;;  %s1549_s7 = inlined_call_operand.vmem [shape: f32[2,16,64], index: 7, kind: output, shape index: {}]  }
   0x1 LB: > { %s941_s25 = sadd.s32 4294967295, %s1286_s24   ;;  %p945_p0 = scmp.ge.s32.totalorder %s1286_s24, 1  ;;  %s1286_s24 = sphi %s1328_s24, %s17_s24  }
   0x2   : > { %p237_p1 = scmp.lt.s32.totalorder %s1286_s24, 3 }
   0x4   : > { %p238_p2 = pnand %p945_p0, %p237_p1 }
   0x5   : > { %v283_v0 = vld [vmem:[%s1543_s1] sm:$0xff] (!%p238_p2)  ;;  %v284_v1 = vld [vmem:[%s1543_s1 + $0x8] sm:$0xff] (!%p238_p2)  ;;  %v285_v2 = vld [vmem:[%s1543_s1 + $0x10] sm:$0xff] (!%p238_p2)  ;;  %p269_p3 = scmp.lt.s32.totalorder (!%p238_p2), %s941_s25, 1  ;;  %vm291_vm0 = vcmask (!%p238_p2), 523264   ;;  %vm468_vm1 = vcmask (!%p238_p2), 1040384  }
   0x6   : > { %241 = sbr.rel (%p238_p2) target bundleno = 509 (0x1fd), region = 48  ;;  %v1176_v3 = vpack.c.bf16 (!%p238_p2), %v284_v1, %v283_v0  ;;  %v286_v4 = vld [vmem:[%s1543_s1 + $0x18] sm:$0xff] (!%p238_p2)  ;;  %v287_v6 = vld [vmem:[%s1543_s1 + $0x20] sm:$0xff] (!%p238_p2)  ;;  %v288_v7 = vld [vmem:[%s1543_s1 + $0x28] sm:$0xff] (!%p238_p2)  ;;  %vm552_vm2 = vcmask (!%p238_p2), 1046528  }
   0x7   : > { %v1180_v5 = vpack.c.bf16 (!%p238_p2), %v286_v4, %v285_v2  ;;  %v960_v8 = vld [vmem:[%s1543_s1 + $0x80] sm:$0xff] (!%p238_p2)  ;;  %v961_v9 = vld [vmem:[%s1543_s1 + $0x88] sm:$0xff] (!%p238_p2)  ;;  %v962_v11 = vld [vmem:[%s1543_s1 + $0x90] sm:$0xff] (!%p238_p2)  ;;  %v1184_v13 = vpack.c.bf16 (!%p238_p2), %v288_v7, %v287_v6 }
   0x8   : > { %1177 = vmatprep.subr.bf16.mxu0 (!%p238_p2), %v1176_v3  ;;  %v1192_v10 = vpack.c.bf16 (!%p238_p2), %v961_v9, %v960_v8  ;;  %v963_v12 = vld [vmem:[%s1543_s1 + $0x98] sm:$0xff] (!%p238_p2)  ;;  %v964_v15 = vld [vmem:[%s1543_s1 + $0xa0] sm:$0xff] (!%p238_p2)  ;;  %v965_v16 = vld [vmem:[%s1543_s1 + $0xa8] sm:$0xff] (!%p238_p2) }
   0x9   : > { %1179 = vmatpush3.bf16.msra.mxu0 (!%p238_p2), %v1176_v3  ;;  %v1196_v14 = vpack.c.bf16 (!%p238_p2), %v963_v12, %v962_v11  ;;  %v289_v17 = vld [vmem:[%s1543_s1 + $0x30] sm:$0xff] (!%p238_p2)  ;;  %v290_v18 = vld [vmem:[%s1543_s1 + $0x38] sm:$0xff] (!%p238_p2)  ;;  %v1200_v20 = vpack.c.bf16 (!%p238_p2), %v965_v16, %v964_v15  ;;  %v952_v24 = vld [vmem:[%s1543_s1 + $0x40] sm:$0xff] (!%p238_p2) }
   0xa   : > { %1181 = vmatprep.subr.bf16.mxu0 (!%p238_p2), %v1180_v5  ;;  %1193 = vmatprep.subr.bf16.mxu1 (!%p238_p2), %v1192_v10  ;;  %v1188_v21 = vpack.c.bf16 (!%p238_p2), %v290_v18, %v289_v17  ;;  %v966_v22 = vld [vmem:[%s1543_s1 + $0xb0] sm:$0xff] (!%p238_p2)  ;;  %v967_v23 = vld [vmem:[%s1543_s1 + $0xb8] sm:$0xff] (!%p238_p2)  ;;  %v953_v25 = vld [vmem:[%s1543_s1 + $0x48] sm:$0xff] (!%p238_p2) }
   0xb   : > { %1195 = vmatpush3.bf16.msra.mxu1 (!%p238_p2), %v1192_v10  ;;  %v1204_v26 = vpack.c.bf16 (!%p238_p2), %v967_v23, %v966_v22  ;;  %v1208_v27 = vpack.c.bf16 (!%p238_p2), %v953_v25, %v952_v24  ;;  %v954_v28 = vld [vmem:[%s1543_s1 + $0x50] sm:$0xff] (!%p238_p2)  ;;  %v955_v29 = vld [vmem:[%s1543_s1 + $0x58] sm:$0xff] (!%p238_p2)  ;;  %v956_v32 = vld [vmem:[%s1543_s1 + $0x60] sm:$0xff] (!%p238_p2) }
   0xc   : > { %1197 = vmatprep.subr.bf16.mxu1 (!%p238_p2), %v1196_v14  ;;  %v1212_v31 = vpack.c.bf16 (!%p238_p2), %v955_v29, %v954_v28  ;;  %v957_v33 = vld [vmem:[%s1543_s1 + $0x68] sm:$0xff] (!%p238_p2)  ;;  %v958_v35 = vld [vmem:[%s1543_s1 + $0x70] sm:$0xff] (!%p238_p2)  ;;  %v959_v36 = vld [vmem:[%s1543_s1 + $0x78] sm:$0xff] (!%p238_p2) }
   0xd   : > { %s1551_s25 = smov (!%p269_p3, %s941_s25), 1  ;;  %1183 = vmatpush3.bf16.msra.mxu0 %v1180_v5  ;;  %v1216_v34 = vpack.c.bf16 %v957_v33, %v956_v32  ;;  %v1220_v37 = vpack.c.bf16 %v959_v36, %v958_v35  ;;  %v585_v38 = vld [vmem:[%s1546_s4] sm:$0xff]  ;;  %v586_v39 = vld [vmem:[%s1546_s4 + $0x8] sm:$0xff]  ;;  %v587_v44 = vld [vmem:[%s1546_s4 + $0x10] sm:$0xff] }
   0xe   : > { %s1000_s19 = sshll.u32 %s1551_s25, 4  ;;  %1185 = vmatprep.subr.bf16.mxu0 %v1184_v13  ;;  %v1224_v40 = vpack.c.bf16 %v586_v39, %v585_v38  ;;  %v984_v41 = vld [vmem:[%s1546_s4 + $0x80] sm:$0xff]  ;;  %v985_v42 = vld [vmem:[%s1546_s4 + $0x88] sm:$0xff]  ;;  %v588_v45 = vld [vmem:[%s1546_s4 + $0x18] sm:$0xff] }
   0xf   : > { %s273_s28 = scalar_lea.vmem %s1542_s0, %s1000_s19  ;;  %1199 = vmatpush3.bf16.msra.mxu1 %v1196_v14  ;;  %v1240_v43 = vpack.c.bf16 %v985_v42, %v984_v41  ;;  %v1228_v46 = vpack.c.bf16 %v588_v45, %v587_v44  ;;  %v986_v47 = vld [vmem:[%s1546_s4 + $0x90] sm:$0xff]  ;;  %v987_v48 = vld [vmem:[%s1546_s4 + $0x98] sm:$0xff]  ;;  %v589_v50 = vld [vmem:[%s1546_s4 + $0x20] sm:$0xff]  ;;  %s278_s12 = scalar_lea.vmem %s1549_s7, %s1000_s19 }
  0x10   : > { %v1386_v19 = vld [vmem:[%s273_s28] sm:$0xff]  ;;  %1201 = vmatprep.subr.bf16.mxu1 %v1200_v20  ;;  %v1410_v30 = vld [vmem:[%s273_s28 + $0x8] sm:$0xff]  ;;  %v1244_v49 = vpack.c.bf16 %v987_v48, %v986_v47  ;;  %v591_v56 = vld [vmem:[%s1546_s4 + $0x30] sm:$0xff] }
  0x11   : > { %1078 = vmatprep.mubr.msk.f32.mxu0 %vm291_vm0, %v1386_v19  ;;  %1097 = vmatprep.mubr.msk.f32.mxu1 %vm291_vm0, %v1386_v19  ;;  %v590_v51 = vld [vmem:[%s1546_s4 + $0x28] sm:$0xff]  ;;  %v988_v53 = vld [vmem:[%s1546_s4 + $0xa0] sm:$0xff]  ;;  %v592_v57 = vld [vmem:[%s1546_s4 + $0x38] sm:$0xff] }
  0x12   : > { %1187 = vmatpush3.bf16.msra.mxu0 %v1184_v13  ;;  %v1232_v52 = vpack.c.bf16 %v590_v51, %v589_v50  ;;  %v989_v54 = vld [vmem:[%s1546_s4 + $0xa8] sm:$0xff]  ;;  %v1236_v58 = vpack.c.bf16 %v592_v57, %v591_v56  ;;  %v990_v59 = vld [vmem:[%s1546_s4 + $0xb0] sm:$0xff]  ;;  %v991_v60 = vld [vmem:[%s1546_s4 + $0xb8] sm:$0xff] }
  0x13   : > { %1189 = vmatprep.subr.bf16.mxu0 %v1188_v21  ;;  %1203 = vmatpush3.bf16.msra.mxu1 %v1200_v20  ;;  %v1248_v55 = vpack.c.bf16 %v989_v54, %v988_v53  ;;  %v1252_v61 = vpack.c.bf16 %v991_v60, %v990_v59  ;;  %v976_v62 = vld [vmem:[%s1546_s4 + $0x40] sm:$0xff]  ;;  %v977_v63 = vld [vmem:[%s1546_s4 + $0x48] sm:$0xff]  ;;  %v979_v28 = vld [vmem:[%s1546_s4 + $0x58] sm:$0xff] }
  0x14   : > { %1205 = vmatprep.subr.bf16.mxu1 %v1204_v26  ;;  %v1256_v0 = vpack.c.bf16 %v977_v63, %v976_v62  ;;  %v972_v16 = vld [vmem:[%s1544_s2] ss:$0 sm:$0xff]  ;;  %v981_v35 = vld [vmem:[%s1546_s4 + $0x68] sm:$0xff]  ;;  %v983_v38 = vld [vmem:[%s1546_s4 + $0x78] sm:$0xff] }
  0x15   : > { %v973_v20 = vld [vmem:[%s1545_s3] ss:$0 sm:$0xff] }
  0x16   : > { %1191 = vmatpush3.bf16.msra.mxu0 %v1188_v21 }
  0x17   : > { %1209 = vmatprep.subr.bf16.mxu0 %v1208_v27  ;;  %1207 = vmatpush3.bf16.msra.mxu1 %v1204_v26 }
  0x18   : > { %1225 = vmatprep.subr.bf16.mxu1 %v1224_v40 }
  0x19   : > { %1079 = vmatmul.mubr.msk.f32.vlgmr.msra.gmra.mrb[0].mxu0 %vm291_vm0, %v1410_v30 }
  0x1a   : > { %1211 = vmatpush3.bf16.msra.mxu0 %v1208_v27  ;;  %1116 = vmatprep.mubr.msk.f32.mxu0 %vm291_vm0, %v1386_v19  ;;  %v978_v27 = vld [vmem:[%s1546_s4 + $0x50] sm:$0xff] }
  0x1b   : > { %1213 = vmatprep.subr.bf16.mxu0 %v1212_v31  ;;  %1098 = vmatmul.mubr.msk.f32.vlgmr.msra.gmra.mrb[0].mxu1 %vm291_vm0, %v1410_v30  ;;  %v1260_v32 = vpack.c.bf16 %v979_v28, %v978_v27 }
  0x1c   : > { %1227 = vmatpush3.bf16.msra.mxu1 %v1224_v40 }
  0x1d   : > { %1229 = vmatprep.subr.bf16.mxu1 %v1228_v46 }
  0x1e   : > { %1215 = vmatpush3.bf16.msra.mxu0 %v1212_v31 }
  0x1f   : > { %1217 = vmatprep.subr.bf16.mxu0 %v1216_v34 }
  0x20   : > { %1231 = vmatpush3.bf16.msra.mxu1 %v1228_v46 }
  0x21   : > { %1233 = vmatprep.subr.bf16.mxu1 %v1232_v52 }
  0x22   : > { %1219 = vmatpush3.bf16.msra.mxu0 %v1216_v34  ;;  %v980_v34 = vld [vmem:[%s1546_s4 + $0x60] sm:$0xff] }
  0x23   : > { %1221 = vmatprep.subr.bf16.mxu0 %v1220_v37  ;;  %v1264_v36 = vpack.c.bf16 %v981_v35, %v980_v34 }
  0x24   : > { %1235 = vmatpush3.bf16.msra.mxu1 %v1232_v52 }
  0x25   : > { %1237 = vmatprep.subr.bf16.mxu1 %v1236_v58 }
  0x26   : > { %1223 = vmatpush3.bf16.msra.mxu0 %v1220_v37  ;;  %v982_v37 = vld [vmem:[%s1546_s4 + $0x70] sm:$0xff] }
  0x27   : > { %1241 = vmatprep.subr.bf16.mxu0 %v1240_v43  ;;  %v1268_v39 = vpack.c.bf16 %v983_v38, %v982_v37 }
  0x28   : > { %1239 = vmatpush3.bf16.msra.mxu1 %v1236_v58  ;;  %v997_v58 = vld [vmem:[%s1548_s6] ss:$0 sm:$0xff] }
  0x29   : > { %1117 = vmatmul.mubr.msk.f32.vlgmr.msra.gmra.mrb[2].mxu0 %vm291_vm0, %v1410_v30  ;;  %1257 = vmatprep.subr.bf16.mxu1 %v1256_v0 }
  0x2a   : > { %1243 = vmatpush3.bf16.msra.mxu0 %v1240_v43 }
  0x2b   : > { %1245 = vmatprep.subr.bf16.mxu0 %v1244_v49 }
  0x2e   : > { %1247 = vmatpush3.bf16.msra.mxu0 %v1244_v49 }
  0x2f   : > { %1249 = vmatprep.subr.bf16.mxu0 %v1248_v55 }
  0x32   : > { %1251 = vmatpush3.bf16.msra.mxu0 %v1248_v55  ;;  %v996_v55 = vld [vmem:[%s1547_s5] ss:$0 sm:$0xff] }
  0x33   : > { %1253 = vmatprep.subr.bf16.mxu0 %v1252_v61 }
  0x36   : > { %1255 = vmatpush3.bf16.msra.mxu0 %v1252_v61 }
  0xec   : > { %v1080_v1 = vpop.f32.mrb[0].mxu0 }
  0xed   : > { %v470_v2 = vrot.slane %v1080_v1, 7  ;;  %v364_v3 = vpop.f32.mrb[1].mxu0 }
  0xee   : > { %v469_v4 = vrot.slane %v364_v3, 7  ;;  %v1099_v5 = vpop.f32.mrb[0].mxu1 }
  0xef   : > { %v554_v6 = vrot.slane %v1099_v5, 1  ;;  %v457_v7 = vpop.f32.mrb[1].mxu1 }
  0xf0   : > { %v471_v8 = vsel %vm468_vm1, %v469_v4, %v470_v2  ;;  %v553_v9 = vrot.slane %v457_v7, 1  ;;  %v474_v14 = vsel %vm468_vm1, 0.0, %v469_v4 }
  0xf1   : > { %v558_v11 = vsel %vm552_vm2, %v554_v6, 0.0 }
  0xf2   : > { %v555_v10 = vsel %vm552_vm2, %v553_v9, %v554_v6 }
  0xfc   : > { %v1118_v12 = vpop.f32.mrb[2].mxu0 }
  0xfd   : > { %v547_v13 = vadd.f32 %v1118_v12, %v471_v8  ;;  %v541_v15 = vpop.f32.mrb[3].mxu0 }
  0xfe   : > { %v542_v17 = vadd.f32 %v541_v15, %v474_v14 }
  0xff   : > { %v560_v18 = vadd.f32 %v558_v11, %v547_v13 }
 0x100   : > { %v559_v21 = vadd.f32 %v555_v10, %v542_v17 }
 0x101   : > { %v568_v22 = vmul.f32 %v972_v16, %v560_v18 }
 0x102   : > { %v567_v23 = vmul.f32 %v972_v16, %v559_v21 }
 0x103   : > { %v576_v24 = vadd.f32 %v973_v20, %v568_v22 }
 0x104   : > { %v575_v25 = vadd.f32 %v973_v20, %v567_v23 }
 0x105   : > { %v580_v26 = vmul.f32 0.01, %v576_v24  ;;  %vm578_vm4 = vcmp.gt.f32.partialorder %v576_v24, 0.0 }
 0x106   : > { %vm577_vm3 = vcmp.gt.f32.partialorder %v575_v25, 0.0  ;;  %v579_v29 = vmul.f32 0.01, %v575_v25 }
 0x107   : > { %v582_v33 = vsel %vm578_vm4, %v576_v24, %v580_v26 }
 0x108   : > { %v581_v31 = vsel %vm577_vm3, %v575_v25, %v579_v29 }
 0x109   : > { %1135 = vmatprep.mubr.msk.f32.mxu1 %vm291_vm0, %v581_v31  ;;  %1154 = vmatprep.mubr.msk.f32.mxu0 %vm291_vm0, %v581_v31 }
 0x10a   : > { %1136 = vmatmul.mubr.msk.f32.vlgmr.msra.gmra.mrb[2].mxu1 %vm291_vm0, %v582_v33  ;;  %1155 = vmatmul.mubr.msk.f32.vlgmr.msra.gmra.mrb[4].mxu0 %vm291_vm0, %v582_v33 }
 0x10b   : > { %1259 = vmatpush3.bf16.msra.mxu1 %v1256_v0  ;;  %1173 = vmatprep.mubr.msk.f32.mxu1 %vm291_vm0, %v581_v31 }
 0x10c   : > { %1261 = vmatprep.subr.bf16.mxu1 %v1260_v32 }
 0x10f   : > { %1263 = vmatpush3.bf16.msra.mxu1 %v1260_v32 }
 0x110   : > { %1265 = vmatprep.subr.bf16.mxu1 %v1264_v36 }
 0x113   : > { %1267 = vmatpush3.bf16.msra.mxu1 %v1264_v36 }
 0x114   : > { %1269 = vmatprep.subr.bf16.mxu1 %v1268_v39 }
 0x117   : > { %1271 = vmatpush3.bf16.msra.mxu1 %v1268_v39 }
 0x11a   : > { %1174 = vmatmul.mubr.msk.f32.vlgmr.msra.gmra.mrb[4].mxu1 %vm291_vm0, %v582_v33 }
 0x1dd   : > { %v1137_v40 = vpop.f32.mrb[2].mxu1  ;;  %v1156_v41 = vpop.f32.mrb[4].mxu0 }
 0x1de   : > { %v770_v42 = vrot.slane %v1137_v40, 7  ;;  %v853_v43 = vrot.slane %v1156_v41, 1  ;;  %v665_v44 = vpop.f32.mrb[3].mxu1  ;;  %v758_v45 = vpop.f32.mrb[5].mxu0 }
 0x1df   : > { %v769_v46 = vrot.slane %v665_v44, 7  ;;  %v852_v47 = vrot.slane %v758_v45, 1 }
 0x1e0   : > { %v857_v54 = vsel %vm552_vm2, %v853_v43, 0.0 }
 0x1e1   : > { %v771_v48 = vsel %vm468_vm1, %v769_v46, %v770_v42  ;;  %v854_v49 = vsel %vm552_vm2, %v852_v47, %v853_v43  ;;  %v774_v52 = vsel %vm468_vm1, 0.0, %v769_v46 }
 0x1ed   : > { %v1175_v50 = vpop.f32.mrb[4].mxu1 }
 0x1ee   : > { %v847_v51 = vadd.f32 %v1175_v50, %v771_v48  ;;  %v841_v53 = vpop.f32.mrb[5].mxu1 }
 0x1ef   : > { %v842_v56 = vadd.f32 %v841_v53, %v774_v52 }
 0x1f0   : > { %v859_v57 = vadd.f32 %v857_v54, %v847_v51 }
 0x1f1   : > { %v858_v59 = vadd.f32 %v854_v49, %v842_v56 }
 0x1f2   : > { %v867_v60 = vmul.f32 %v996_v55, %v859_v57 }
 0x1f3   : > { %v866_v61 = vmul.f32 %v996_v55, %v858_v59 }
 0x1f4   : > { %v875_v62 = vadd.f32 %v997_v58, %v867_v60 }
 0x1f5   : > { %v874_v63 = vadd.f32 %v997_v58, %v866_v61 }
 0x1f6   : > { %vm877_vm5 = vcmp.gt.f32.partialorder %v875_v62, 0.0  ;;  %v879_v0 = vmul.f32 0.01, %v875_v62 }
 0x1f7   : > { %vm876_vm6 = vcmp.gt.f32.partialorder %v874_v63, 0.0  ;;  %v878_v1 = vmul.f32 0.01, %v874_v63 }
 0x1f8   : > { %v881_v2 = vsel %vm877_vm5, %v875_v62, %v879_v0 }
 0x1f9   : > { %v883_v3 = vadd.f32 %v881_v2, %v1410_v30  ;;  %v880_v4 = vsel %vm876_vm6, %v874_v63, %v878_v1 }
 0x1fa   : > { %v882_v5 = vadd.f32 %v880_v4, %v1386_v19 }
 0x1fb   : > { %885 = vst.msk [vmem:[%s278_s12 + $0x8] sm:$0xff] %vm291_vm0, %v883_v3 }
 0x1fc   : > { %884 = vst.msk [vmem:[%s278_s12] sm:$0xff] %vm291_vm0, %v882_v5 }
 0x1fd PF: > { %s17_s24 = sadd.s32 1, %s1286_s24  }
 0x1fe   : > { %p14_p4 = scmp.ge.s32.totalorder %s17_s24, 4  }
 0x200   :  { %16 = sbr.rel (!%p14_p4) target bundleno = 1 (0x1), region = 82 }

</bundles_post_ra>
